<compile_context>
chip_gen: v6e
topology: v6e:2x2x1
jax: 0.10.0
libtpu: 0.0.40
codegen_flags: <defaults>
</compile_context>

<pallas_src>
import jax
import jax.numpy as jnp
from jax.experimental import pallas as pl
from jax.experimental.pallas import tpu as pltpu

# Below this, Mosaic compile/launch overhead dominates; use XLA's native copy.
_MIN_PALLAS_BYTES = 1 << 20          # 1 MiB
_TARGET_DMA_BYTES = 4 << 20          # aim for >= ~4 MiB per outstanding DMA
_MAX_OUTSTANDING = 8                 # max outstanding DMAs per grid step


def _make_hbm_copy_kernel(per_step, plan):
    """Build a kernel where each grid step copies `per_step` leading-dim rows
    of the array via a few large outstanding HBM->HBM DMAs.  `plan` is a
    static (trace-time) list of (row_offset, row_count) chunks covering
    [0, per_step)."""

    def kernel(x_hbm, o_hbm, sems):
        base = pl.program_id(0) * per_step
        copies = [
            pltpu.make_async_copy(
                x_hbm.at[pl.ds(base + off, size)],
                o_hbm.at[pl.ds(base + off, size)],
                sems.at[c],
            )
            for c, (off, size) in enumerate(plan)
        ]
        for cp in copies:       # issue every chunk (kept in flight together)
            cp.start()
        for cp in copies:       # then drain
            cp.wait()

    return kernel


def _pallas_identity_copy(x):
    """Materialized identity copy: direct HBM->HBM DMA, no VMEM staging."""
    nbytes = int(x.size) * jnp.dtype(x.dtype).itemsize
    # Tiny tensors, empty tensors, or rank < 3 (where leading-dim slices could
    # be sub-tile): XLA's native copy has lower fixed cost -- use it.
    if x.ndim < 3 or x.size == 0 or nbytes < _MIN_PALLAS_BYTES:
        return jnp.copy(x)

    d0 = x.shape[0]
    # Two "parallel" grid steps (one per v7x TensorCore) when the leading dim
    # splits evenly; otherwise a single step.  Leading-dim slices of a >=3-D
    # array are always whole-(8,128)-tile aligned, so any offset is a legal DMA.
    n_grid = 2 if (d0 % 2 == 0 and nbytes >= 2 * _MIN_PALLAS_BYTES) else 1
    per_step = d0 // n_grid
    bytes_per_row = nbytes // d0

    # Static chunk plan: a few large outstanding DMAs per grid step.
    n_out = max(1, min(_MAX_OUTSTANDING, per_step,
                       (per_step * bytes_per_row) // _TARGET_DMA_BYTES))
    chunk = -(-per_step // n_out)        # ceil div
    plan = []
    off = 0
    while off < per_step:
        size = min(chunk, per_step - off)
        plan.append((off, size))
        off += size

    return pl.pallas_call(
        _make_hbm_copy_kernel(per_step, plan),
        out_shape=jax.ShapeDtypeStruct(x.shape, x.dtype),
        grid_spec=pltpu.PrefetchScalarGridSpec(
            num_scalar_prefetch=0,
            grid=(n_grid,),
            in_specs=[pl.BlockSpec(memory_space=pl.ANY)],   # raw HBM ref, no auto-DMA
            out_specs=pl.BlockSpec(memory_space=pl.ANY),    # written via manual DMA
            scratch_shapes=[pltpu.SemaphoreType.DMA((len(plan),))],
        ),
        compiler_params=pltpu.CompilerParams(
            dimension_semantics=("parallel",),
            # The kernel uses no VMEM beyond DMA semaphores; keep the scoped
            # footprint tight so this op never pressures co-scheduled work.
            vmem_limit_bytes=16 << 20,
        ),
    )(x)


def identity_first_stage_forward(x, *args, materialize=False, donate=False, **kwargs):
    """Pallas equivalent of IdentityFirstStage.forward: returns x unchanged.

    The PyTorch forward is a pure pass-through, so the default (and fastest)
    path returns x directly with zero HBM traffic.

    materialize=True  -> return a freshly materialized buffer (Pallas
                         HBM->HBM DMA copy, or jnp.copy for tiny/awkward
                         shapes).
    donate=True       -> the caller no longer needs x, so the "copy" is a
                         no-op alias: we return x itself instead of spending
                         2N bytes of HBM bandwidth re-writing identical bits.
    """
    if not materialize or donate:
        return x
    return _pallas_identity_copy(x)


def identity_first_stage_encode(x, *args, **kwargs):
    return identity_first_stage_forward(x, *args, **kwargs)


def identity_first_stage_decode(x, *args, **kwargs):
    return identity_first_stage_forward(x, *args, **kwargs)


def identity_first_stage_quantize(x, *args, vq_interface=False, **kwargs):
    y = identity_first_stage_forward(x, *args, **kwargs)
    if vq_interface:
        return (y, None, [None, None, None])
    return y


if __name__ == "__main__":
    # IdentityFirstStage has no parameters (its __init__ only stores a flag),
    # so there are no weights to initialize.
    key = jax.random.PRNGKey(0)
    k_small, k_big = jax.random.split(key)

    # Typical first-stage image tensor at small scale (NCHW).
    x = jax.random.normal(k_small, (2, 4, 16, 16), dtype=jnp.float32)

    # 1) Default path: true identity, no kernel, no HBM traffic.
    y = jax.block_until_ready(identity_first_stage_forward(x))
    assert y.shape == x.shape and y.dtype == x.dtype
    assert bool(jnp.all(y == x)), "identity (pass-through) mismatch"

    # 2) Donated materialize: short-circuits to the input buffer (no kernel,
    #    no wasted 2N-byte HBM pass).
    y_don = jax.block_until_ready(
        identity_first_stage_forward(x, materialize=True, donate=True))
    assert bool(jnp.all(y_don == x)), "identity (donated) mismatch"

    # 3) Tiny materialized copy: falls back to XLA's copy (fresh buffer).
    y_small = jax.block_until_ready(
        identity_first_stage_forward(x, materialize=True))
    assert y_small.shape == x.shape and y_small.dtype == x.dtype
    assert bool(jnp.all(y_small == x)), "identity (small copy) mismatch"

    # 4) Large-enough materialized copy: exercises the Pallas HBM->HBM DMA
    #    kernel (2 "parallel" grid steps, one large DMA each).
    x_big = jax.random.normal(k_big, (2, 4, 256, 256), dtype=jnp.float32)  # 2 MiB
    y_big = jax.block_until_ready(
        identity_first_stage_forward(x_big, materialize=True))
    assert y_big.shape == x_big.shape and y_big.dtype == x_big.dtype
    assert bool(jnp.all(y_big == x_big)), "identity (pallas DMA copy) mismatch"

    # 5) encode / decode / quantize paths.
    jax.block_until_ready(identity_first_stage_encode(x))
    jax.block_until_ready(identity_first_stage_decode(x))
    q, emb_loss, info = identity_first_stage_quantize(x, vq_interface=True)
    jax.block_until_ready(q)
    assert bool(jnp.all(q == x))
    assert emb_loss is None and info == [None, None, None]

    print("KERNEL_OK")
</pallas_src>

<mosaic_0001>
module attributes {stable_mosaic.version = 11 : i64} {
  func.func @kernel(%arg0: i32, %arg1: memref<2x4x256x256xf32, #tpu.memory_space<any>>, %arg2: memref<2x4x256x256xf32, #tpu.memory_space<any>>, %arg3: memref<1x!tpu.dma_semaphore, #tpu.memory_space<semaphore_mem>>) attributes {dimension_semantics = [#tpu.dimension_semantics<parallel>], iteration_bounds = array<i64: 2>, scalar_prefetch = 0 : i64, scratch_operands = 1 : i64, tpu.core_type = #tpu.core_type<tc>, window_params = [{}, {}]} {
    %c1_i32 = arith.constant 1 : i32
    %0 = arith.muli %arg0, %c1_i32 : i32
    %c0_i32 = arith.constant 0 : i32
    %1 = arith.addi %0, %c0_i32 : i32
    %c0_i32_0 = arith.constant 0 : i32
    %2 = arith.addi %0, %c0_i32_0 : i32
    %c0_i32_1 = arith.constant 0 : i32
    %c0_i32_2 = arith.constant 0 : i32
    %c0_i32_3 = arith.constant 0 : i32
    %c0_i32_4 = arith.constant 0 : i32
    %3 = tpu.memref_slice %arg1[%1, %c0_i32_2, %c0_i32_3, %c0_i32_4] : memref<2x4x256x256xf32, #tpu.memory_space<any>> -> memref<1x4x256x256xf32, #tpu.memory_space<any>>
    %c0_i32_5 = arith.constant 0 : i32
    %c0_i32_6 = arith.constant 0 : i32
    %c0_i32_7 = arith.constant 0 : i32
    %4 = tpu.memref_slice %arg2[%2, %c0_i32_5, %c0_i32_6, %c0_i32_7] : memref<2x4x256x256xf32, #tpu.memory_space<any>> -> memref<1x4x256x256xf32, #tpu.memory_space<any>>
    %5 = tpu.memref_slice %arg3[%c0_i32_1] : memref<1x!tpu.dma_semaphore, #tpu.memory_space<semaphore_mem>> -> memref<1x!tpu.dma_semaphore, #tpu.memory_space<semaphore_mem>>
    %6 = tpu.memref_squeeze %5 : memref<1x!tpu.dma_semaphore, #tpu.memory_space<semaphore_mem>> -> memref<!tpu.dma_semaphore, #tpu.memory_space<semaphore_mem>>
    tpu.enqueue_dma source(%3 : memref<1x4x256x256xf32, #tpu.memory_space<any>>) target(%4 : memref<1x4x256x256xf32, #tpu.memory_space<any>>) target_semaphore(%6 : memref<!tpu.dma_semaphore, #tpu.memory_space<semaphore_mem>>)
    %c0_i32_8 = arith.constant 0 : i32
    %c0_i32_9 = arith.constant 0 : i32
    %c0_i32_10 = arith.constant 0 : i32
    %c0_i32_11 = arith.constant 0 : i32
    %7 = tpu.memref_slice %arg1[%1, %c0_i32_9, %c0_i32_10, %c0_i32_11] : memref<2x4x256x256xf32, #tpu.memory_space<any>> -> memref<1x4x256x256xf32, #tpu.memory_space<any>>
    %c0_i32_12 = arith.constant 0 : i32
    %c0_i32_13 = arith.constant 0 : i32
    %c0_i32_14 = arith.constant 0 : i32
    %8 = tpu.memref_slice %arg2[%2, %c0_i32_12, %c0_i32_13, %c0_i32_14] : memref<2x4x256x256xf32, #tpu.memory_space<any>> -> memref<1x4x256x256xf32, #tpu.memory_space<any>>
    %9 = tpu.memref_slice %arg3[%c0_i32_8] : memref<1x!tpu.dma_semaphore, #tpu.memory_space<semaphore_mem>> -> memref<1x!tpu.dma_semaphore, #tpu.memory_space<semaphore_mem>>
    %10 = tpu.memref_squeeze %9 : memref<1x!tpu.dma_semaphore, #tpu.memory_space<semaphore_mem>> -> memref<!tpu.dma_semaphore, #tpu.memory_space<semaphore_mem>>
    tpu.wait_dma2 semaphore(%10 : memref<!tpu.dma_semaphore, #tpu.memory_space<semaphore_mem>>) src(%7 : memref<1x4x256x256xf32, #tpu.memory_space<any>>) dst(%8 : memref<1x4x256x256xf32, #tpu.memory_space<any>>)
    return
  }
}

</mosaic_0001>

<bundles_post_ra>
// kernel: tpu_custom_call.1
= control target key start
LH: loop header
LB: loop body
LE: loop exit
PB: predicated region body
PF: predicated region fallthrough
CT: control target
= control target key end

     0   :  { %s69_s6 = smov 0   ;;  %s92_s0 = inlined_call_operand.hbm [shape: f32[2,4,256,256], index: 0, kind: input, shape index: {}]   ;;  %s93_s1 = inlined_call_operand.hbm [shape: f32[2,4,256,256], index: 1, kind: output, shape index: {}]  }
   0x1 LB: > { %s50_s7 = sshll.u32 %s71_s6, 15  ;;  %s73_s14 = smov [#allocation2]   ;;  %s71_s6 = sphi %s69_s6, %s11_s6  }
   0x2   : > { %s15_s10 = scalar_lea.hbm %s92_s0, %s50_s7  ;;  %s17_s13 = scalar_lea.hbm %s93_s1, %s50_s7 }
   0x3   : > { %s74_s15 = smov 131072   ;;  %s75_s16 = smov 0  }
   0x4   : > { %24 = dma.general %s15_s10, 32768, %s17_s13, %s73_s14, %s74_s15, [#allocation4], %s75_s16, 0  }
   0x5   : > { %67 = dma.done.wait [#allocation2], 32768 }
   0x6   : > { %68 = vsyncadd [#allocation2], 4294934528  ;;  %s11_s6 = sadd.s32 1, %s71_s6  }
   0x7   : > { %p8_p0 = scmp.ge.s32.totalorder %s11_s6, 2  }
   0x9   :  { %10 = sbr.rel (!%p8_p0) target bundleno = 1 (0x1), region = 21 }
   0xe   :  { %31 = vsyncmov [#allocation2] }
  0x11   :  { %s32_s17 = vpop.sfrf %31 }
  0x12   :  { %p49_p1 = scmp.ne.s32.totalorder %s32_s17, 0 }
  0x14   :  { %36 = shalt.err (%p49_p1)  }

</bundles_post_ra>
